<compile_context>
chip_gen: v5e
topology: v5e:2x2
jax: 0.10.0
libtpu: 0.0.40
codegen_flags: <defaults>
</compile_context>

<pallas_src>
import functools

import jax
import jax.numpy as jnp
from jax.experimental import pallas as pl
from jax.experimental.pallas import tpu as pltpu

IN_FEATURES = 32
OUT_FEATURES = 32
OUT_PAD = 128          # lane-dense output width (multiple of 128 lanes)
TM_MAX = 512           # row-tile for large batches (multiple of 8 sublanes)


def linear_kernel(x_ref, wt_ref, b_ref, o_ref):
    # x_ref: (TM, IN), wt_ref: (IN, OUT_PAD), b_ref: (1, OUT_PAD), o_ref: (TM, OUT_PAD)
    y = jnp.dot(x_ref[...], wt_ref[...], preferred_element_type=jnp.float32)
    o_ref[...] = (y + b_ref[...]).astype(o_ref.dtype)


@functools.partial(jax.jit, static_argnames=("out_features",))
def pallas_linear(x, weight_t_pad, bias_pad, out_features):
    B, IN = x.shape
    IN2, OUTP = weight_t_pad.shape
    assert IN == IN2
    assert bias_pad.shape == (1, OUTP)

    # Whole-batch tile when small (block == full array dims, always legal);
    # otherwise 512-row tiles (multiple of 8) streamed over a "parallel" grid.
    tm = B if B <= TM_MAX else TM_MAX
    grid = (pl.cdiv(B, tm),)

    out = pl.pallas_call(
        linear_kernel,
        out_shape=jax.ShapeDtypeStruct((B, OUTP), x.dtype),
        grid=grid,
        in_specs=[
            pl.BlockSpec((tm, IN), lambda i: (i, 0)),       # x: streamed by rows
            pl.BlockSpec((IN, OUTP), lambda i: (0, 0)),     # weight: VMEM-resident
            pl.BlockSpec((1, OUTP), lambda i: (0, 0)),      # bias:   VMEM-resident
        ],
        out_specs=pl.BlockSpec((tm, OUTP), lambda i: (i, 0)),
        compiler_params=pltpu.CompilerParams(
            dimension_semantics=("parallel",),
        ),
        cost_estimate=pl.CostEstimate(
            flops=2 * B * IN * OUTP,
            bytes_accessed=4 * (B * IN + IN * OUTP + OUTP + B * OUTP),
            transcendentals=0,
        ),
    )(x, weight_t_pad, bias_pad)

    # Drop the zero-padded lanes (fused slice under jit).
    return out[:, :out_features]


class Model:
    """JAX equivalent of the PyTorch Model (Linear(32, 32) with scaled weight)."""

    def __init__(self, weight, bias, scale):
        weight = jnp.asarray(weight, jnp.float32).reshape(OUT_FEATURES, IN_FEATURES)
        bias = jnp.asarray(bias, jnp.float32).reshape(OUT_FEATURES)
        scale = jnp.asarray(scale, jnp.float32).reshape(1)

        # Pre-scale + pre-transpose ONCE: (OUT, IN) -> (IN, OUT), then zero-pad
        # the output axis to 128 lanes so kernel stores are unmasked/lane-dense.
        w_t = (weight * scale[0]).T                                   # (IN, OUT)
        self.weight_t_pad = (
            jnp.zeros((IN_FEATURES, OUT_PAD), jnp.float32).at[:, :OUT_FEATURES].set(w_t)
        )
        self.bias_pad = (
            jnp.zeros((1, OUT_PAD), jnp.float32).at[:, :OUT_FEATURES].set(bias)
        )
        self.out_features = OUT_FEATURES

    def forward(self, x1):
        return pallas_linear(x1, self.weight_t_pad, self.bias_pad, self.out_features)


if __name__ == "__main__":
    key = jax.random.PRNGKey(0)
    k_x, k_w, k_b, k_s, k_xb = jax.random.split(key, 5)

    # Deterministic synthetic parameters matching the module __init__ shapes.
    weight = jax.random.normal(k_w, (32, 32), dtype=jnp.float32)
    bias = jax.random.normal(k_b, (32,), dtype=jnp.float32)
    scale = jax.random.normal(k_s, (1,), dtype=jnp.float32)

    model = Model(weight, bias, scale)

    # --- Spec-sized input: (1, 32), matching the PyTorch example. ---
    x1 = jax.random.normal(k_x, (1, 32), dtype=jnp.float32)
    out = jax.block_until_ready(model.forward(x1))
    ref = x1 @ (weight * scale[0]).T + bias
    assert out.shape == (1, 32)
    assert jnp.allclose(out, ref, atol=1e-5, rtol=1e-5)

    # --- Batched sanity check: exercises the row grid (>1 grid step). ---
    xb = jax.random.normal(k_xb, (1024, 32), dtype=jnp.float32)
    out_b = jax.block_until_ready(model.forward(xb))
    ref_b = xb @ (weight * scale[0]).T + bias
    assert out_b.shape == (1024, 32)
    assert jnp.allclose(out_b, ref_b, atol=1e-4, rtol=1e-4)

    print("KERNEL_OK")
</pallas_src>

<mosaic_0001>
module attributes {stable_mosaic.version = 11 : i64} {
  func.func @linear_kernel(%arg0: i32, %arg1: memref<1x32xf32, #tpu.memory_space<vmem>>, %arg2: memref<32x128xf32, #tpu.memory_space<vmem>>, %arg3: memref<1x128xf32, #tpu.memory_space<vmem>>, %arg4: memref<1x128xf32, #tpu.memory_space<vmem>>) attributes {dimension_semantics = [#tpu.dimension_semantics<parallel>], iteration_bounds = array<i64: 1>, scalar_prefetch = 0 : i64, scratch_operands = 0 : i64, tpu.core_type = #tpu.core_type<tc>, window_params = [{transform_indices = @transform_0, window_bounds = array<i64: 1, 32>}, {pipeline_mode = #tpu.pipeline_mode<synchronous>, transform_indices = @transform_1, window_bounds = array<i64: 32, 128>}, {pipeline_mode = #tpu.pipeline_mode<synchronous>, transform_indices = @transform_2, window_bounds = array<i64: 1, 128>}, {transform_indices = @transform_3, window_bounds = array<i64: 1, 128>}]} {
    %c0 = arith.constant 0 : index
    %c0_0 = arith.constant 0 : index
    %0 = vector.load %arg1[%c0, %c0_0] : memref<1x32xf32, #tpu.memory_space<vmem>>, vector<1x32xf32>
    %c0_1 = arith.constant 0 : index
    %c0_2 = arith.constant 0 : index
    %1 = vector.load %arg2[%c0_1, %c0_2] : memref<32x128xf32, #tpu.memory_space<vmem>>, vector<32x128xf32>
    %cst = arith.constant dense<0.000000e+00> : vector<1x128xf32>
    %2 = tpu.matmul %0, %1, %cst {dimension_numbers = #tpu.dot_dimension_numbers<[1], [0], [0], [1], [0, 0, 1, 1], [], []>} : vector<1x32xf32>, vector<32x128xf32>, vector<1x128xf32> -> vector<1x128xf32>
    %c0_3 = arith.constant 0 : index
    %c0_4 = arith.constant 0 : index
    %3 = vector.load %arg3[%c0_3, %c0_4] : memref<1x128xf32, #tpu.memory_space<vmem>>, vector<1x128xf32>
    %4 = arith.addf %2, %3 : vector<1x128xf32>
    %c0_5 = arith.constant 0 : index
    %c0_6 = arith.constant 0 : index
    %5 = vector.load %arg4[%c0_5, %c0_6] : memref<1x128xf32, #tpu.memory_space<vmem>>, vector<1x128xf32>
    tpu.vector_store %arg4[%c0_5, %c0_6], %4 {strides = array<i32>} : memref<1x128xf32, #tpu.memory_space<vmem>>, vector<1x128xf32>,
    return
  }
  func.func @transform_0(%arg0: i32) -> (i32, i32) {
    %c0_i32 = arith.constant 0 : i32
    %c0_i32_0 = arith.constant 0 : i32
    return %arg0, %c0_i32 : i32, i32
  }
  func.func @transform_1(%arg0: i32) -> (i32, i32) {
    %c0_i32 = arith.constant 0 : i32
    %c0_i32_0 = arith.constant 0 : i32
    %c0_i32_1 = arith.constant 0 : i32
    return %c0_i32, %c0_i32_0 : i32, i32
  }
  func.func @transform_2(%arg0: i32) -> (i32, i32) {
    %c0_i32 = arith.constant 0 : i32
    %c0_i32_0 = arith.constant 0 : i32
    %c0_i32_1 = arith.constant 0 : i32
    return %c0_i32, %c0_i32_0 : i32, i32
  }
  func.func @transform_3(%arg0: i32) -> (i32, i32) {
    %c0_i32 = arith.constant 0 : i32
    %c0_i32_0 = arith.constant 0 : i32
    return %arg0, %c0_i32 : i32, i32
  }
}

</mosaic_0001>

<bundles_post_ra>
// kernel: pallas_linear.1
= control target key start
LH: loop header
LB: loop body
LE: loop exit
PB: predicated region body
PF: predicated region fallthrough
CT: control target
= control target key end

     0   :  { %8 = vsyncpa [#allocation3], 0  ;;  %s215_s0 = inlined_call_operand.hbm [shape: f32[1,32], index: 0, kind: input, shape index: {}]   ;;  %s216_s1 = inlined_call_operand.hbm [shape: f32[32,128], index: 1, kind: input, shape index: {}]   ;;  %s217_s2 = inlined_call_operand.vmem [shape: f32[1,128], index: 2, kind: input, shape index: {}]   ;;  %s218_s3 = inlined_call_operand.hbm [shape: f32[1,128], index: 3, kind: output, shape index: {}]  }
   0x1   :  { %9 = vsyncpa [#allocation6], 0 }
   0x2   :  { %10 = vsyncpa [#allocation4], 0  ;;  %s16_s14 = sshll.u32 %s215_s0, 4  ;;  %s178_s15 = smov [#allocation2]   ;;  %s17_s14 = int_to_ptr.hbm [resolvable:$true] %s16_s14 }
   0x3   :  { %s18_s16 = sshll.u32 %s178_s15, 4  ;;  %s26_s19 = sshll.u32 %s216_s1, 4  ;;  %s19_s16 = int_to_ptr.vmem [resolvable:$true] %s18_s16  ;;  %s27_s19 = int_to_ptr.hbm [resolvable:$true] %s26_s19 }
   0x4   :  { %21 = dma.hbm_to_vmem [thread:$0]  %s17_s14, 16, %s19_s16, [#allocation3]  }
   0x5   :  { %s179_s20 = smov [#allocation5]   ;;  %s180_s22 = smov 128  }
   0x6   :  { %s28_s21 = sshll.u32 %s179_s20, 4  ;;  %s181_s23 = smov 8   ;;  %s29_s21 = int_to_ptr.vmem [resolvable:$true] %s28_s21 }
   0x7   :  { %34 = dma.hbm_to_vmem [thread:$0]  %s27_s19, 512, %s29_s21, [#allocation6], %s180_s22, %s180_s22, %s181_s23  }
   0x8   :  { %172 = dma.done.wait [#allocation3], 16  }
   0x9   :  { %173 = vsyncadd [#allocation3], 4294967280 }
   0xa   :  { %174 = dma.done.wait [#allocation6], 512  }
   0xb   :  { %175 = vsyncadd [#allocation6], 4294966784  ;;  %v49_v0 = vld [vmem:[#allocation5 + $0x18] sm:$0xff]  ;;  %v48_v1 = vld [vmem:[#allocation5 + $0x10] sm:$0xff]  ;;  %vm51_vm0 = vcmask 261120   ;;  %s182_s24 = smov [#allocation7]  }
   0xc   :  { %67 = vmatpush.msra.mxu0 %v49_v0  ;;  %v47_v2 = vld [vmem:[#allocation5 + $0x8] sm:$0xff]  ;;  %v46_v3 = vld [vmem:[#allocation5] sm:$0xff]  ;;  %v45_v4 = vld [vmem:[#allocation2] sm:$0x1]  ;;  %s81_s25 = sshll.u32 %s182_s24, 4  ;;  %s83_s28 = sshll.u32 %s218_s3, 4  ;;  %s82_s25 = int_to_ptr.vmem [resolvable:$true] %s81_s25  ;;  %s84_s28 = int_to_ptr.hbm [resolvable:$true] %s83_s28 }
   0xd   :  { %v50_v5 = vld [vmem:[%s217_s2] sm:$0x1] }
   0xe   :  { %68 = vmatpush.msra.mxu0 %v48_v1 }
  0x10   :  { %69 = vmatpush.msra.mxu0 %v47_v2 }
  0x12   :  { %70 = vmatpush.msra.mxu0 %v46_v3 }
  0x13   :  { %94 = vmatmul.msk.f32.vlgmr.msra.gmra.mxu0 %vm51_vm0, %v45_v4 }
  0x90   :  { %v72_v6 = vpop.f32.mrf.mxu0 }
  0x91   :  { %v73_v7 = vadd.f32 %v72_v6, %v50_v5 }
  0x93   :  { %75 = vst [vmem:[#allocation7] sm:$0x1] %v73_v7 }
  0x94   :  { %86 = dma.vmem_to_hbm [thread:$0]  %s82_s25, 16, %s84_s28, [#allocation4]  }
  0x95   :  { %176 = dma.done.wait [#allocation4], 16  }
  0x96   :  { %177 = vsyncadd [#allocation4], 4294967280 }
  0x97   :  { %91 = vsyncpa [#allocation3], 1 }
  0x98   :  { %92 = vsyncpa [#allocation6], 1 }
  0x99   :  { %93 = vsyncpa [#allocation4], 1 }

</bundles_post_ra>
